<compile_context>
chip_gen: v6e
topology: v6e:2x2x1
jax: 0.10.0
libtpu: 0.0.40
codegen_flags: <defaults>
</compile_context>

<pallas_src>
import functools

import jax
import jax.numpy as jnp
import numpy as np
from jax.experimental import pallas as pl
from jax.experimental.pallas import tpu as pltpu


def _round_up(x, m):
    return ((x + m - 1) // m) * m


# --------------------------------------------------------------------------
# Kernels
# --------------------------------------------------------------------------
def _wn_kernel_noacc(scale_ref, x_ref, v_ref, b_ref, o_ref):
    # One K step covers the whole contraction: write the output directly.
    # x_ref: [tm, tk]   v_ref: [tn, tk]   b_ref: [1, tn]   o_ref: [tm, tn]
    acc = jax.lax.dot_general(
        x_ref[...], v_ref[...],
        dimension_numbers=(((1,), (1,)), ((), ())),   # NT: contract last dims
        preferred_element_type=jnp.float32,
    )
    y = acc * scale_ref[0, 0] + b_ref[...].astype(jnp.float32)
    o_ref[...] = y.astype(o_ref.dtype)


def _wn_kernel_acc(scale_ref, x_ref, v_ref, b_ref, o_ref, acc_ref):
    # Multi-step K reduction with a resident f32 VMEM accumulator.
    k = pl.program_id(2)

    @pl.when(k == 0)
    def _():
        acc_ref[...] = jnp.zeros_like(acc_ref)

    acc_ref[...] += jax.lax.dot_general(
        x_ref[...], v_ref[...],
        dimension_numbers=(((1,), (1,)), ((), ())),   # NT: contract last dims
        preferred_element_type=jnp.float32,
    )

    @pl.when(k == pl.num_programs(2) - 1)
    def _():
        y = acc_ref[...] * scale_ref[0, 0] + b_ref[...].astype(jnp.float32)
        o_ref[...] = y.astype(o_ref.dtype)


# --------------------------------------------------------------------------
# Generation-aware defaults
# --------------------------------------------------------------------------
def _tile_config():
    """Default (tm, tn, tk, vmem_limit_bytes) derived from the TPU generation."""
    vmem_cap = 64 * 1024 * 1024  # conservative fallback (v7x-sized)
    try:
        info = pltpu.get_tpu_info()
        vmem_cap = int(getattr(info, "vmem_capacity_bytes", vmem_cap))
    except Exception:
        pass
    if vmem_cap >= 100 * 1024 * 1024:
        # v5e / v6e: 128 MiB physical VMEM -> ~18 MiB of double-buffered tiles.
        return 512, 1024, 1024, 64 * 1024 * 1024
    # v7x: 64 MiB physical VMEM per TensorCore -> stay well under 32 MiB.
    return 256, 512, 512, 32 * 1024 * 1024


# --------------------------------------------------------------------------
# Wrapper
# --------------------------------------------------------------------------
@functools.partial(jax.jit, static_argnames=("tm", "tn", "tk", "vmem_limit"))
def _weight_norm_linear_impl(x, v, g, b, *, tm, tn, tk, vmem_limit):
    B, In = x.shape
    Out, In2 = v.shape
    assert In == In2 and b.shape == (Out,)

    # Hoisted: scale = g / ||v||_F  (one XLA reduction, applied in epilogue).
    vf = v.astype(jnp.float32)
    scale2d = jnp.reshape(g.astype(jnp.float32) / jnp.sqrt(jnp.sum(vf * vf)),
                          (1, 1))

    itemsize = jnp.dtype(x.dtype).itemsize
    sub = max(8, 32 // itemsize)            # sublane multiple: 8 f32 / 16 bf16 / 32 i8

    # M tile: full batch if it fits, else a sublane-aligned tile.
    tm_eff = B if B <= tm else max(sub, (tm // sub) * sub)
    # N tile: full Out if it fits, else a 128-aligned tile.
    tn_eff = Out if Out <= tn else max(128, (tn // 128) * 128)
    # K tile: full In if it fits (zero padding); otherwise split In into nk
    # near-equal 128-aligned chunks so the explicit zero-pad stays small.
    if In <= tk:
        tk_eff, nk, Ip = In, 1, In
    else:
        nk = -(-In // tk)
        tk_eff = _round_up(-(-In // nk), 128)
        Ip = nk * tk_eff

    # Only the contraction dim ever gets an explicit zero-padded HBM copy;
    # M / N partial edge blocks are masked by Pallas (OOB writes dropped).
    if Ip != In:
        xw = jnp.pad(x, ((0, 0), (0, Ip - In)))
        vw = jnp.pad(v, ((0, 0), (0, Ip - In)))
    else:
        xw, vw = x, v
    b2d = jnp.reshape(b, (1, Out))

    grid_m = -(-B // tm_eff)
    grid_n = -(-Out // tn_eff)

    cost = pl.CostEstimate(
        flops=2 * B * In * Out,
        transcendentals=0,
        bytes_accessed=(xw.size * xw.dtype.itemsize * grid_n      # x re-read per N tile
                        + vw.size * vw.dtype.itemsize * grid_m    # weight re-read per M tile
                        + b2d.size * b2d.dtype.itemsize * grid_m
                        + B * Out * itemsize),
    )

    if nk == 1:
        grid = (grid_m, grid_n)
        kernel = _wn_kernel_noacc
        in_specs = [
            pl.BlockSpec((1, 1), lambda i, j: (0, 0),
                         memory_space=pltpu.MemorySpace.SMEM),        # scale
            pl.BlockSpec((tm_eff, tk_eff), lambda i, j: (i, 0)),      # x
            pl.BlockSpec((tn_eff, tk_eff), lambda i, j: (j, 0)),      # v  [Out, In]
            pl.BlockSpec((1, tn_eff), lambda i, j: (0, j)),           # bias
        ]
        out_spec = pl.BlockSpec((tm_eff, tn_eff), lambda i, j: (i, j))
        scratch = []
        dims = ("parallel", "parallel")
    else:
        grid = (grid_m, grid_n, nk)
        kernel = _wn_kernel_acc
        in_specs = [
            pl.BlockSpec((1, 1), lambda i, j, k: (0, 0),
                         memory_space=pltpu.MemorySpace.SMEM),        # scale
            pl.BlockSpec((tm_eff, tk_eff), lambda i, j, k: (i, k)),   # x
            pl.BlockSpec((tn_eff, tk_eff), lambda i, j, k: (j, k)),   # v  [Out, In]
            pl.BlockSpec((1, tn_eff), lambda i, j, k: (0, j)),        # bias
        ]
        out_spec = pl.BlockSpec((tm_eff, tn_eff), lambda i, j, k: (i, j))
        scratch = [pltpu.VMEM((tm_eff, tn_eff), jnp.float32)]
        dims = ("parallel", "parallel", "arbitrary")

    return pl.pallas_call(
        kernel,
        out_shape=jax.ShapeDtypeStruct((B, Out), x.dtype),
        grid_spec=pltpu.PrefetchScalarGridSpec(
            num_scalar_prefetch=0,
            grid=grid,
            in_specs=in_specs,
            out_specs=out_spec,
            scratch_shapes=scratch,
        ),
        compiler_params=pltpu.CompilerParams(
            dimension_semantics=dims,
            vmem_limit_bytes=vmem_limit,
        ),
        cost_estimate=cost,
    )(scale2d, xw, vw, b2d)


def weight_norm_linear(x, v, g, b, *, tm=None, tn=None, tk=None):
    """y = x @ (v * g / ||v||_F).T + b  via a tiled Pallas TPU matmul kernel."""
    tm_d, tn_d, tk_d, vmem_limit = _tile_config()
    return _weight_norm_linear_impl(
        x, v, g, b,
        tm=tm_d if tm is None else tm,
        tn=tn_d if tn is None else tn,
        tk=tk_d if tk is None else tk,
        vmem_limit=vmem_limit,
    )


def _reference(x, v, g, b):
    w_eff = v * (g / jnp.sqrt(jnp.sum(v.astype(jnp.float32) ** 2)))
    return (jnp.dot(x, w_eff.T, precision=jax.lax.Precision.HIGHEST)
            + b[None, :])


if __name__ == "__main__":
    key = jax.random.PRNGKey(0)

    def make_case(key, B, In, Out):
        kw, kb, kx, key = jax.random.split(key, 4)
        bound = 1.0 / np.sqrt(In)
        w0 = jax.random.uniform(kw, (Out, In), jnp.float32, -bound, bound)
        bias = jax.random.uniform(kb, (Out,), jnp.float32, -bound, bound)
        # WeightNorm._reset(): g = ||w||_F (scalar), v = w / g
        g = jnp.sqrt(jnp.sum(w0 * w0))
        v = w0 / g
        x = jax.random.normal(kx, (B, In), jnp.float32)
        return key, x, v, g, bias

    # --- test 1: the module's toy shapes (single-block fast path) -----------
    key, x, v, g, bias = make_case(key, 8, 32, 32)
    y = jax.block_until_ready(weight_norm_linear(x, v, g, bias))
    np.testing.assert_allclose(np.asarray(y), np.asarray(_reference(x, v, g, bias)),
                               rtol=1e-5, atol=1e-5)

    # --- test 2: non-128-aligned shapes, still one block per dim ------------
    key, x2, v2, g2, bias2 = make_case(key, 24, 320, 160)
    y2 = jax.block_until_ready(weight_norm_linear(x2, v2, g2, bias2))
    np.testing.assert_allclose(np.asarray(y2), np.asarray(_reference(x2, v2, g2, bias2)),
                               rtol=1e-5, atol=1e-5)

    # --- test 3: forced small tiles -> multi-step K reduction, partial M/N
    #             edge blocks (no M/N padding) and explicit K zero-padding ---
    key, x3, v3, g3, bias3 = make_case(key, 192, 640, 384)
    y3 = jax.block_until_ready(
        weight_norm_linear(x3, v3, g3, bias3, tm=128, tn=256, tk=256))
    np.testing.assert_allclose(np.asarray(y3), np.asarray(_reference(x3, v3, g3, bias3)),
                               rtol=5e-5, atol=5e-5)

    print("KERNEL_OK")
</pallas_src>

<mosaic_0001>
module attributes {stable_mosaic.version = 11 : i64} {
  func.func @_wn_kernel_noacc(%arg0: i32, %arg1: i32, %arg2: memref<1x1xf32, #tpu.memory_space<smem>>, %arg3: memref<8x32xf32, #tpu.memory_space<vmem>>, %arg4: memref<32x32xf32, #tpu.memory_space<vmem>>, %arg5: memref<1x32xf32, #tpu.memory_space<vmem>>, %arg6: memref<8x32xf32, #tpu.memory_space<vmem>>) attributes {dimension_semantics = [#tpu.dimension_semantics<parallel>, #tpu.dimension_semantics<parallel>], iteration_bounds = array<i64: 1, 1>, scalar_prefetch = 0 : i64, scratch_operands = 0 : i64, tpu.core_type = #tpu.core_type<tc>, window_params = [{transform_indices = @transform_0, window_bounds = array<i64: 1, 1>}, {transform_indices = @transform_1, window_bounds = array<i64: 8, 32>}, {transform_indices = @transform_2, window_bounds = array<i64: 32, 32>}, {transform_indices = @transform_3, window_bounds = array<i64: 1, 32>}, {transform_indices = @transform_4, window_bounds = array<i64: 8, 32>}]} {
    %c0 = arith.constant 0 : index
    %c0_0 = arith.constant 0 : index
    %0 = vector.load %arg3[%c0, %c0_0] : memref<8x32xf32, #tpu.memory_space<vmem>>, vector<8x32xf32>
    %c0_1 = arith.constant 0 : index
    %c0_2 = arith.constant 0 : index
    %1 = vector.load %arg4[%c0_1, %c0_2] : memref<32x32xf32, #tpu.memory_space<vmem>>, vector<32x32xf32>
    %cst = arith.constant dense<0.000000e+00> : vector<8x32xf32>
    %2 = tpu.matmul %0, %1, %cst {dimension_numbers = #tpu.dot_dimension_numbers<[1], [1], [0], [0], [0, 0, 1, 0], [], []>} : vector<8x32xf32>, vector<32x32xf32>, vector<8x32xf32> -> vector<8x32xf32>
    %c0_3 = arith.constant 0 : index
    %c0_4 = arith.constant 0 : index
    %3 = memref.load %arg2[%c0_3, %c0_4] : memref<1x1xf32, #tpu.memory_space<smem>>
    %4 = vector.broadcast %3 : f32 to vector<8x32xf32>
    %5 = arith.mulf %2, %4 : vector<8x32xf32>
    %c0_5 = arith.constant 0 : index
    %c0_6 = arith.constant 0 : index
    %6 = vector.load %arg5[%c0_5, %c0_6] : memref<1x32xf32, #tpu.memory_space<vmem>>, vector<1x32xf32>
    %7 = vector.broadcast %6 : vector<1x32xf32> to vector<8x32xf32>
    %8 = arith.addf %5, %7 : vector<8x32xf32>
    %c0_7 = arith.constant 0 : index
    %c0_8 = arith.constant 0 : index
    %9 = vector.load %arg6[%c0_7, %c0_8] : memref<8x32xf32, #tpu.memory_space<vmem>>, vector<8x32xf32>
    tpu.vector_store %arg6[%c0_7, %c0_8], %8 {strides = array<i32>} : memref<8x32xf32, #tpu.memory_space<vmem>>, vector<8x32xf32>,
    return
  }
  func.func @transform_0(%arg0: i32, %arg1: i32) -> (i32, i32) {
    %c0_i32 = arith.constant 0 : i32
    %c0_i32_0 = arith.constant 0 : i32
    %c0_i32_1 = arith.constant 0 : i32
    return %c0_i32, %c0_i32_0 : i32, i32
  }
  func.func @transform_1(%arg0: i32, %arg1: i32) -> (i32, i32) {
    %c0_i32 = arith.constant 0 : i32
    %c0_i32_0 = arith.constant 0 : i32
    return %arg0, %c0_i32 : i32, i32
  }
  func.func @transform_2(%arg0: i32, %arg1: i32) -> (i32, i32) {
    %c0_i32 = arith.constant 0 : i32
    %c0_i32_0 = arith.constant 0 : i32
    return %arg1, %c0_i32 : i32, i32
  }
  func.func @transform_3(%arg0: i32, %arg1: i32) -> (i32, i32) {
    %c0_i32 = arith.constant 0 : i32
    %c0_i32_0 = arith.constant 0 : i32
    return %c0_i32, %arg1 : i32, i32
  }
  func.func @transform_4(%arg0: i32, %arg1: i32) -> (i32, i32) {
    %c0_i32 = arith.constant 0 : i32
    return %arg0, %arg1 : i32, i32
  }
}

</mosaic_0001>

<bundles_post_ra>
// kernel: _weight_norm_linear_impl.1
= control target key start
LH: loop header
LB: loop body
LE: loop exit
PB: predicated region body
PF: predicated region fallthrough
CT: control target
= control target key end

     0   :  { %vm24_vm0 = vcmask 261120   ;;  %v183_v1 = vmov 0.0   ;;  %vm184_vm1 = vmmov 0   ;;  %s241_s0 = inlined_call_operand.<no memory space> [shape: f32[1,1], index: 0, kind: input, shape index: {}]   ;;  %s242_s1 = inlined_call_operand.vmem [shape: f32[8,32], index: 1, kind: input, shape index: {}]   ;;  %s243_s2 = inlined_call_operand.vmem [shape: f32[32,32], index: 2, kind: input, shape index: {}]   ;;  %s244_s3 = inlined_call_operand.vmem [shape: f32[1,32], index: 3, kind: input, shape index: {}]   ;;  %s245_s4 = inlined_call_operand.hbm [shape: f32[8,32], index: 4, kind: output, shape index: {}]  }
   0x1   :  { %v23_v0 = vld [vmem:[%s243_s2 + $0x18] sm:$0xff]  ;;  %147 = vmatprep.subr.mxu0 %v183_v1  ;;  %155 = vmatprep.mubr.msk.f32.mxu0 %vm184_vm1, %v183_v1 }
   0x2   :  { %10 = vsyncpa [#allocation4], 0  ;;  %148 = vmatpush3.xpose.msk.msra.mxu0 %vm24_vm0, %v23_v0  ;;  %v22_v2 = vld [vmem:[%s243_s2 + $0x10] sm:$0xff]  ;;  %v21_v3 = vld [vmem:[%s243_s2 + $0x8] sm:$0xff]  ;;  %v111_v6 = vstv %s241_s0  ;;  %s185_s29 = smov [#allocation3]  }
   0x3   :  { %149 = vmatprep.subr.mxu0 %v183_v1  ;;  %v20_v4 = vld [vmem:[%s243_s2] sm:$0xff]  ;;  %s128_s30 = sshll.u32 %s185_s29, 4  ;;  %s129_s30 = int_to_ptr.vmem [resolvable:$true] %s128_s30 }
   0x4   :  { %v19_v5 = vld [vmem:[%s242_s1] sm:$0xff]  ;;  %s161_s1 = scalar_lea.vmem %s129_s30, 128  ;;  %p166_p1 = scmp.lt.s32.totalorder %s129_s30, %s129_s30 }
   0x5   :  { %v141_v8 = vld [vmem:[%s244_s3] ss:$0 sm:$0xff]  ;;  %p162_p0 = scmp.ne.s32.totalorder %s129_s30, %s161_s1  ;;  %p167_p2 = scmp.lt.s32.totalorder %s161_s1, %s161_s1 }
   0x6   :  { %150 = vmatpush3.xpose.msk.msra.mxu0 %vm24_vm0, %v22_v2 }
   0x7   :  { %151 = vmatprep.subr.mxu0 %v183_v1  ;;  %p168_p3 = por %p167_p2, %p166_p1 }
   0x9   :  { %p169_p4 = pnand %p168_p3, %p162_p0 }
   0xa   :  { %152 = vmatpush3.xpose.msk.msra.mxu0 %vm24_vm0, %v21_v3 }
   0xb   :  { %153 = vmatprep.subr.mxu0 %v183_v1 }
   0xe   :  { %154 = vmatpush3.xpose.msk.msra.mxu0 %vm24_vm0, %v20_v4 }
  0x11   :  { %156 = vmatmul.mubr.msk.f32.vlgmr.msra.gmra.mxu0 %vm24_vm0, %v19_v5 }
  0xd1   :  { %v106_v7 = vpop.f32.mrf.mxu0 }
  0xd2   :  { %v112_v9 = vmul.f32 %v111_v6, %v106_v7 }
  0xd3   :  { %v157_v10 = vpop.f32.mrf.mxu0 }
  0xd4   :  { %v120_v11 = vadd.f32 %v141_v8, %v112_v9 }
  0xd6   :  { %121 = vst.msk [vmem:[#allocation3] sm:$0xff] %vm24_vm0, %v120_v11 }
  0xd7   :  { %172 = shalt.err (!%p169_p4)
}
  0xd8   :  { %131 = dma.vmem_to_hbm [thread:$0]  %s129_s30, 128, %s245_s4, [#allocation4]  }
  0xd9   :  { %181 = dma.done.wait [#allocation4], 128  }
  0xda   :  { %182 = vsyncadd [#allocation4], 4294967168 }
  0xdb   :  { %135 = vsyncpa [#allocation4], 1 }

</bundles_post_ra>
